<compile_context>
chip_gen: v7x
topology: tpu7x:2x2x1
jax: 0.10.0
libtpu: 0.0.40
codegen_flags: <defaults>
</compile_context>

<pallas_src>
import jax
import jax.numpy as jnp
from jax import lax
from jax.experimental import pallas as pl
from jax.experimental.pallas import tpu as pltpu


def mlp_kernel(xt_ref, p_ref, o_ref):
    # xt_ref: (1, Bp)  batch on lanes
    # p_ref : (H, 4)   packed params: col0=w1, col1=b1, col2=w2, col3=b2 (bcast)
    xt = xt_ref[...]                                    # (1, Bp)
    p = p_ref[...]                                      # (H, 4)

    # hidden = relu(w1 * x + b1): VPU broadcast outer-product -> (H, Bp)
    h = jnp.maximum(p[:, 0:1] * xt + p[:, 1:2], 0.0)

    # predict = sum_h (h * w2) + b2 : VPU multiply + sublane reduce -> (1, Bp)
    y = jnp.sum(h * p[:, 2:3], axis=0, keepdims=True) + p[0:1, 3:4]
    o_ref[...] = y.astype(o_ref.dtype)


def net_forward(x, w1, b1, w2, b2):
    """x: (B, 1); w1: (1, H); b1: (1, H); w2: (H, 1); b2: (1, 1)  ->  (B, 1)"""
    B, F = x.shape
    H = w1.shape[1]
    O = w2.shape[1]
    # TODO(synk): kernel is specialized to the F=1 / O=1 shapes of the reference
    # script; general (F, O) would reintroduce a real contraction path.
    assert F == 1 and O == 1, "kernel specialized for Net(1, H, 1)"

    LANES = 128
    Bp = ((B + LANES - 1) // LANES) * LANES

    # Lane-dense input: single pad HLO (no zeros+dynamic-update-slice).
    xt = jnp.pad(x.reshape(1, B).astype(jnp.float32), ((0, 0), (0, Bp - B)))

    # One packed parameter operand -> one DMA instead of four.
    params = jnp.stack(
        [
            w1.reshape(H).astype(jnp.float32),
            b1.reshape(H).astype(jnp.float32),
            w2.reshape(H).astype(jnp.float32),
            jnp.broadcast_to(b2.reshape(()).astype(jnp.float32), (H,)),
        ],
        axis=1,
    )  # (H, 4)

    out = pl.pallas_call(
        mlp_kernel,
        out_shape=jax.ShapeDtypeStruct((1, Bp), jnp.float32),
        in_specs=[
            pl.BlockSpec(memory_space=pltpu.MemorySpace.VMEM),   # xt
            pl.BlockSpec(memory_space=pltpu.MemorySpace.VMEM),   # packed params
        ],
        out_specs=pl.BlockSpec(memory_space=pltpu.MemorySpace.VMEM),
    )(xt, params)

    # Single slice + reshape back to the (B, 1) activation layout.
    return lax.slice(out, (0, 0), (1, B)).reshape(B, 1)


if __name__ == "__main__":
    # Shapes implied by the reference script: x = linspace(-1,1,100).unsqueeze(1) -> (100, 1)
    n_feature, n_hidden, n_output = 1, 32, 1
    batch = 100

    key = jax.random.PRNGKey(0)
    k1, k2, k3, k4 = jax.random.split(key, 4)

    # Deterministic init mirroring PyTorch Linear's U(-1/sqrt(fan_in), 1/sqrt(fan_in))
    bound1 = 1.0 / (n_feature ** 0.5)
    bound2 = 1.0 / (n_hidden ** 0.5)
    w1 = jax.random.uniform(k1, (n_feature, n_hidden), jnp.float32, -bound1, bound1)
    b1 = jax.random.uniform(k2, (1, n_hidden), jnp.float32, -bound1, bound1)
    w2 = jax.random.uniform(k3, (n_hidden, n_output), jnp.float32, -bound2, bound2)
    b2 = jax.random.uniform(k4, (1, n_output), jnp.float32, -bound2, bound2)

    # Input matching the PyTorch script: torch.unsqueeze(torch.linspace(-1, 1, 100), dim=1)
    x = jnp.linspace(-1.0, 1.0, batch, dtype=jnp.float32)[:, None]

    out = net_forward(x, w1, b1, w2, b2)
    out = jax.block_until_ready(out)

    # Pure-JAX reference check
    ref = jnp.maximum(x @ w1 + b1, 0.0) @ w2 + b2
    assert out.shape == (batch, n_output)
    assert jnp.allclose(out, ref, atol=1e-5, rtol=1e-5)

    print("KERNEL_OK")
</pallas_src>

<mosaic_0001>
module attributes {stable_mosaic.version = 11 : i64} {
  func.func @mlp_kernel(%arg0: memref<1x128xf32, #tpu.memory_space<vmem>>, %arg1: memref<32x4xf32, #tpu.memory_space<vmem>>, %arg2: memref<1x128xf32, #tpu.memory_space<vmem>>) attributes {dimension_semantics = [], scalar_prefetch = 0 : i64, scratch_operands = 0 : i64, tpu.core_type = #tpu.core_type<tc>} {
    %c0 = arith.constant 0 : index
    %c0_0 = arith.constant 0 : index
    %0 = vector.load %arg0[%c0, %c0_0] : memref<1x128xf32, #tpu.memory_space<vmem>>, vector<1x128xf32>
    %c0_1 = arith.constant 0 : index
    %c0_2 = arith.constant 0 : index
    %1 = vector.load %arg1[%c0_1, %c0_2] : memref<32x4xf32, #tpu.memory_space<vmem>>, vector<32x4xf32>
    %2 = vector.extract_strided_slice %1 {offsets = [0, 0], sizes = [32, 1], strides = [1, 1]} : vector<32x4xf32> to vector<32x1xf32>
    %3 = vector.broadcast %2 : vector<32x1xf32> to vector<32x128xf32>
    %4 = vector.broadcast %0 : vector<1x128xf32> to vector<32x128xf32>
    %5 = arith.mulf %3, %4 : vector<32x128xf32>
    %6 = vector.extract_strided_slice %1 {offsets = [0, 1], sizes = [32, 1], strides = [1, 1]} : vector<32x4xf32> to vector<32x1xf32>
    %7 = vector.broadcast %6 : vector<32x1xf32> to vector<32x128xf32>
    %8 = arith.addf %5, %7 : vector<32x128xf32>
    %cst = arith.constant 0.000000e+00 : f32
    %9 = vector.broadcast %cst : f32 to vector<32x128xf32>
    %10 = arith.maximumf %8, %9 : vector<32x128xf32>
    %11 = vector.extract_strided_slice %1 {offsets = [0, 2], sizes = [32, 1], strides = [1, 1]} : vector<32x4xf32> to vector<32x1xf32>
    %12 = vector.broadcast %11 : vector<32x1xf32> to vector<32x128xf32>
    %13 = arith.mulf %10, %12 : vector<32x128xf32>
    %cst_3 = arith.constant dense<0.000000e+00> : vector<128xf32>
    %14 = vector.multi_reduction <add>, %13, %cst_3 [0] : vector<32x128xf32> to vector<128xf32>
    %15 = vector.shape_cast %14 : vector<128xf32> to vector<1x128xf32>
    %16 = vector.extract_strided_slice %1 {offsets = [0, 3], sizes = [1, 1], strides = [1, 1]} : vector<32x4xf32> to vector<1x1xf32>
    %17 = vector.broadcast %16 : vector<1x1xf32> to vector<1x128xf32>
    %18 = arith.addf %15, %17 : vector<1x128xf32>
    %c0_4 = arith.constant 0 : index
    %c0_5 = arith.constant 0 : index
    %19 = vector.load %arg2[%c0_4, %c0_5] : memref<1x128xf32, #tpu.memory_space<vmem>>, vector<1x128xf32>
    tpu.vector_store %arg2[%c0_4, %c0_5], %18 {strides = array<i32>} : memref<1x128xf32, #tpu.memory_space<vmem>>, vector<1x128xf32>,
    return
  }
}

</mosaic_0001>

<bundles_post_ra>
// kernel: tpu_custom_call.1
= control target key start
LH: loop header
LB: loop body
LE: loop exit
PB: predicated region body
PF: predicated region fallthrough
CT: control target
= control target key end

     0   :  { %v159_v2 = vmov 0   ;;  %s206_s0 = inlined_call_operand.vmem [shape: f32[1,128], index: 0, kind: input, shape index: {}]   ;;  %s207_s1 = inlined_call_operand.vmem [shape: f32[32,4], index: 1, kind: input, shape index: {}]   ;;  %s208_s2 = inlined_call_operand.hbm [shape: f32[1,128], index: 2, kind: output, shape index: {}]  }
   0x1   :  { %v15_v0 = vld [vmem:[%s207_s1 + $0x10] sm:$0xff]  ;;  %v13_v1 = vld [vmem:[%s207_s1] sm:$0xff]  ;;  %127 = vset.pattern.permute.xlu1 %v159_v2  ;;  %126 = vset.pattern.permute.xlu0 %v159_v2 }
   0x2   :  { %7 = vsyncpa [#allocation3], 0  ;;  %29 = vperm.xlu1 %127, %v15_v0   ;;  %19 = vperm.xlu0 %126, %v13_v1   ;;  %v14_v3 = vld [vmem:[%s207_s1 + $0x8] sm:$0xff]  ;;  %v160_v4 = vmov 1   ;;  %v16_v5 = vld [vmem:[%s207_s1 + $0x18] sm:$0xff]  ;;  %v161_v6 = vmov 2  }
   0x3   :  { %v162_v7 = vmov 3   ;;  %v120_v14 = vld [vmem:[%s206_s0] ss:$0 sm:$0xff]  ;;  %s163_s0 = smov [#allocation2]  }
   0x4   :  { %s112_s18 = sshll.u32 %s163_s0, 4  ;;  %s113_s18 = int_to_ptr.vmem [resolvable:$true] %s112_s18 }
   0x5   :  { %s135_s19 = scalar_lea.vmem %s113_s18, 16  ;;  %s139_s20 = scalar_lea.vmem %s113_s18, 32 }
   0x6   :  { %128 = vset.pattern.permute.xlu1 %v160_v4  ;;  %24 = vperm.xlu0 %126, %v14_v3   ;;  %p136_p0 = scmp.ne.s32.totalorder %s113_s18, %s135_s19  ;;  %p140_p1 = scmp.lt.s32.totalorder %s113_s18, %s113_s18 }
   0x7   :  { %48 = vperm.xlu1 %128, %v13_v1   ;;  %p141_p2 = scmp.lt.s32.totalorder %s139_s20, %s135_s19 }
   0x9   :  { %p142_p3 = por %p141_p2, %p140_p1 }
   0xa   :  { %129 = vset.pattern.permute.xlu0 %v160_v4 }
   0xb   :  { %130 = vset.pattern.permute.xlu1 %v159_v2  ;;  %52 = vperm.xlu0 %129, %v14_v3   ;;  %p143_p4 = pnand %p142_p3, %p136_p0 }
   0xc   :  { %34 = vperm.xlu1 %130, %v16_v5  }
   0xf   :  { %60 = vperm.xlu0 %129, %v16_v5  }
  0x10   :  { %131 = vset.pattern.permute.xlu1 %v160_v4 }
  0x11   :  { %56 = vperm.xlu1 %131, %v15_v0  }
  0x13   :  { %133 = vset.pattern.permute.xlu0 %v161_v6 }
  0x14   :  { %76 = vperm.xlu0 %133, %v14_v3  }
  0x15   :  { %132 = vset.pattern.permute.xlu1 %v161_v6 }
  0x16   :  { %72 = vperm.xlu1 %132, %v13_v1  }
  0x18   :  { %134 = vset.pattern.permute.xlu0 %v162_v7 }
  0x19   :  { %101 = vperm.xlu0 %134, %v13_v1  }
  0x1a   :  { %80 = vperm.xlu1 %132, %v15_v0  }
  0x1e   :  { %84 = vperm.xlu1 %132, %v16_v5  }
  0x81   :  { %v30_v8 = vpop.permute.xlu1 %29  ;;  %v20_v9 = vpop.permute.xlu0 %19 }
  0x82   :  { %v43_v15 = vmul.f32 %v120_v14, %v20_v9  ;;  %v45_v19 = vmul.f32 %v120_v14, %v30_v8 }
  0x85   :  { %v25_v10 = vpop.permute.xlu0 %24 }
  0x86   :  { %v49_v11 = vpop.permute.xlu1 %48  ;;  %v44_v16 = vmul.f32 %v120_v14, %v25_v10 }
  0x87   :  { %v63_v20 = vadd.f32 %v49_v11, %v43_v15 }
  0x89   :  { %v67_v25 = vmax.f32 %v63_v20, 0.0 }
  0x8a   :  { %v53_v12 = vpop.permute.xlu0 %52 }
  0x8b   :  { %v35_v13 = vpop.permute.xlu1 %34  ;;  %v64_v21 = vadd.f32 %v53_v12, %v44_v16 }
  0x8c   :  { %v46_v22 = vmul.f32 %v120_v14, %v35_v13 }
  0x8d   :  { %v68_v27 = vmax.f32 %v64_v21, 0.0 }
  0x8e   :  { %v61_v18 = vpop.permute.xlu0 %60 }
  0x8f   :  { %v66_v28 = vadd.f32 %v61_v18, %v46_v22 }
  0x90   :  { %v57_v17 = vpop.permute.xlu1 %56 }
  0x91   :  { %v65_v23 = vadd.f32 %v57_v17, %v45_v19  ;;  %v70_v34 = vmax.f32 %v66_v28, 0.0 }
  0x93   :  { %v77_v26 = vpop.permute.xlu0 %76  ;;  %v69_v29 = vmax.f32 %v65_v23, 0.0 }
  0x94   :  { %v88_v32 = vmul.f32 %v77_v26, %v68_v27 }
  0x95   :  { %v73_v24 = vpop.permute.xlu1 %72 }
  0x96   :  { %v87_v30 = vmul.f32 %v73_v24, %v67_v25 }
  0x98   :  { %v91_v35 = vadd.f32 %v88_v32, %v87_v30  ;;  %v102_v45 = vpop.permute.xlu0 %101 }
  0x99   :  { %v81_v31 = vpop.permute.xlu1 %80 }
  0x9a   :  { %v89_v33 = vmul.f32 %v81_v31, %v69_v29 }
  0x9c   :  { %v92_v37 = vadd.f32 %v91_v35, %v89_v33 }
  0x9d   :  { %v85_v36 = vpop.permute.xlu1 %84 }
  0x9e   :  { %v90_v38 = vmul.f32 %v85_v36, %v70_v34 }
  0xa0   :  { %v93_v39 = vadd.f32 %v92_v37, %v90_v38 }
  0xa2   :  { %v94_v40 = vrot.slane %v93_v39, 4 }
  0xa4   :  { %v95_v41 = vadd.f32 %v94_v40, %v93_v39 }
  0xa6   :  { %v96_v42 = vrot.slane %v95_v41, 2 }
  0xa8   :  { %v97_v43 = vadd.f32 %v96_v42, %v95_v41 }
  0xaa   :  { %v98_v44 = vrot.slane %v97_v43, 1 }
  0xac   :  { %v99_v46 = vadd.f32 %v98_v44, %v97_v43 }
  0xae   :  { %v104_v47 = vadd.f32 %v102_v45, %v99_v46 }
  0xb0   :  { %105 = vst [vmem:[#allocation2] sm:$0x1] %v104_v47 }
  0xb1   :  { %146 = shalt.err (!%p143_p4)
}
  0xb2   :  { %s147_s23 = scalar_lea.hbm %s208_s2, 16 }
  0xb3   :  { %p148_p5 = scmp.ne.s32.totalorder %s208_s2, %s147_s23  ;;  %p151_p6 = scmp.lt.u32.totalorder %s147_s23, %s208_s2 }
  0xb5   :  { %p153_p7 = pnand %p151_p6, %p148_p5 }
  0xb7   :  { %156 = shalt.err (!%p153_p7)
}
  0xb8   :  { %115 = dma.vmem_to_hbm [thread:$0]  %s113_s18, 16, %s208_s2, [#allocation3]  }
  0xb9   :  { %157 = dma.done.wait [#allocation3], 16  }
  0xba   :  { %158 = vsyncadd [#allocation3], 4294967280 }
  0xbb   :  { %119 = vsyncpa [#allocation3], 1 }

</bundles_post_ra>
